<compile_context>
chip_gen: v7x
topology: tpu7x:2x2x1
jax: 0.10.0
libtpu: 0.0.40
codegen_flags: <defaults>
</compile_context>

<pallas_src>
import jax
import jax.numpy as jnp
from jax.experimental import pallas as pl
from jax.experimental.pallas import tpu as pltpu


def _round_up(v, m):
    return ((v + m - 1) // m) * m


def _qnet_kernel(x_ref, a_ref, w1o_ref, w1a_ref, b1_ref,
                 w2_ref, b2_ref, w3_ref, b3_ref, o_ref):
    """One batch tile:
       h1 = relu(x @ W1_obs + a @ W1_act + b1)
       h2 = relu(h1 @ W2 + b2)
       q  = W3 . h2 + b3   stored as a lane-dense (1, tile) row."""
    wdt = w1o_ref.dtype            # f32, or bf16 (MXU-native on v6e/v7x)
    # fc1 + ReLU   (torch.cat([x, a], 1) folded into two matmuls)
    h1 = jnp.dot(x_ref[...].astype(wdt), w1o_ref[...],
                 preferred_element_type=jnp.float32)
    # K=act_dim (tiny) MXU push; accepted waste (review: low priority).
    h1 = h1 + jnp.dot(a_ref[...].astype(wdt), w1a_ref[...],
                      preferred_element_type=jnp.float32)
    h1 = jnp.maximum(h1 + b1_ref[...], 0.0)
    # fc2 + ReLU
    h2 = jnp.dot(h1.astype(wdt), w2_ref[...],
                 preferred_element_type=jnp.float32)
    h2 = jnp.maximum(h2 + b2_ref[...], 0.0)
    # fc3: contract over the feature dim with the batch left in lanes so the
    # result is already a (.., tile) row -> one dense vst per 128 rows,
    # no masked (tile, 1) column stores.  w3_ref is (8, h2): real weights in
    # row 0, rows 1..7 are zero padding (MXU-friendly M=8 operand).
    q = jnp.einsum('oh,bh->ob', w3_ref[...], h2,
                   preferred_element_type=jnp.float32)
    o_ref[...] = (q[0:1, :] + b3_ref[0, 0]).astype(o_ref.dtype)


def soft_q_forward(x_nchw, a, kernel_params, *,
                   max_batch_tile=2048,
                   gridless_limit_bytes=4 * 1024 * 1024):
    """x_nchw: (B, C, H, W), a: (B, A)  ->  (B, 1) f32."""
    w1_obs, w1_act, b1, w2, b2, w3_rows, b3 = kernel_params
    B = x_nchw.shape[0]
    x_flat = x_nchw.reshape(B, -1)          # torch.flatten(1, -1), row-major
    obs_dim = x_flat.shape[1]
    act_dim = a.shape[1]
    h1 = w1_obs.shape[1]
    h2 = w2.shape[1]

    weight_args = (w1_obs, w1_act, b1, w2, b2, w3_rows, b3)
    weight_bytes = sum(int(w.size) * w.dtype.itemsize for w in weight_args)
    stream_bytes = B * (obs_dim * x_flat.dtype.itemsize
                        + act_dim * a.dtype.itemsize)
    cost = pl.CostEstimate(
        flops=2 * B * ((obs_dim + act_dim) * h1 + h1 * h2 + h2),
        transcendentals=0,
        bytes_accessed=stream_bytes + B * 4 + weight_bytes)

    smem = pltpu.MemorySpace.SMEM
    vmem = pltpu.MemorySpace.VMEM

    if stream_bytes <= gridless_limit_bytes:
        # Small/medium batch: single invocation, no grid -> no pipeline
        # prologue/epilogue or per-step DMA-descriptor overhead.
        out = pl.pallas_call(
            _qnet_kernel,
            out_shape=jax.ShapeDtypeStruct((1, B), jnp.float32),
            in_specs=[pl.BlockSpec(memory_space=vmem)] * 8
                     + [pl.BlockSpec(memory_space=smem)],
            out_specs=pl.BlockSpec(memory_space=vmem),
            cost_estimate=cost,
        )(x_flat, a, *weight_args)
        return out.reshape(B, 1)

    # Large batch: tile the rows.  Tiles are multiples of 128 (lane-dense
    # output row + sublane-aligned inputs); prefer >= 2 tiles so the v7x
    # second TensorCore gets half the batch; cap the tile so double-buffered
    # f32 inputs stay at a few MiB (well under every generation's scoped
    # VMEM limit).
    bt = min(max_batch_tile, _round_up(pl.cdiv(B, 2), 128))
    n_tiles = pl.cdiv(B, bt)
    bt = _round_up(pl.cdiv(B, n_tiles), 128)
    n_tiles = pl.cdiv(B, bt)
    b_pad = n_tiles * bt
    if b_pad != B:
        # Padded tail tile (extra rows computed, then sliced off).  Divisible
        # batch sizes avoid this extra HBM copy.
        x_flat = jnp.pad(x_flat, ((0, b_pad - B), (0, 0)))
        a = jnp.pad(a, ((0, b_pad - B), (0, 0)))

    in_specs = [
        pl.BlockSpec((bt, obs_dim), lambda i: (i, 0)),
        pl.BlockSpec((bt, act_dim), lambda i: (i, 0)),
        # Weights / biases: constant index maps -> VMEM-resident across steps.
        pl.BlockSpec(w1_obs.shape, lambda i: (0, 0)),
        pl.BlockSpec(w1_act.shape, lambda i: (0, 0)),
        pl.BlockSpec(b1.shape, lambda i: (0, 0)),
        pl.BlockSpec(w2.shape, lambda i: (0, 0)),
        pl.BlockSpec(b2.shape, lambda i: (0, 0)),
        pl.BlockSpec(w3_rows.shape, lambda i: (0, 0)),
        pl.BlockSpec((1, 1), lambda i: (0, 0), memory_space=smem),
    ]
    out = pl.pallas_call(
        _qnet_kernel,
        out_shape=jax.ShapeDtypeStruct((n_tiles, bt), jnp.float32),
        grid=(n_tiles,),
        in_specs=in_specs,
        out_specs=pl.BlockSpec((1, bt), lambda i: (i, 0)),
        cost_estimate=cost,
        compiler_params=pltpu.CompilerParams(
            dimension_semantics=("parallel",),
            vmem_limit_bytes=32 * 1024 * 1024),
    )(x_flat, a, *weight_args)
    # (n_tiles, bt) row-major == padded batch order; drop the pad rows.
    return out.reshape(b_pad, 1)[:B]


def init_params(key, in_dim, mlp_size):
    """Kaiming-normal (fan_out, relu) weights, zero biases — matches
    initialize_fc_weights().  Weights stored as (in, out)."""
    dims = [in_dim, mlp_size[0], mlp_size[1], 1]
    params = []
    for i in range(3):
        key, sub = jax.random.split(key)
        fan_out = dims[i + 1]
        std = (2.0 / fan_out) ** 0.5          # gain=sqrt(2), mode='fan_out'
        w = std * jax.random.normal(sub, (dims[i], dims[i + 1]),
                                    dtype=jnp.float32)
        b = jnp.zeros((1, dims[i + 1]), dtype=jnp.float32)
        params.extend([w, b])
    return tuple(params)


def prepare_params(params, obs_dim, weights_dtype=jnp.float32):
    """One-time repack into kernel layout (outside the hot path).
    weights_dtype=jnp.bfloat16 halves weight VMEM/HBM bytes and runs fc1/fc2
    MXU-native on v6e/v7x (f32 accumulation kept in-kernel)."""
    w1, b1, w2, b2, w3, b3 = params
    w1_obs = w1[:obs_dim].astype(weights_dtype)     # (obs_dim, h1)
    w1_act = w1[obs_dim:].astype(weights_dtype)     # (act_dim, h1)
    w2c = w2.astype(weights_dtype)                  # (h1, h2)
    h2 = w2.shape[1]
    # fc3 stays f32 (tiny); real weights in row 0 of an (8, h2) slab.
    w3_rows = jnp.zeros((8, h2), jnp.float32).at[0].set(
        w3[:, 0].astype(jnp.float32))
    b3_sc = b3.reshape(1, 1).astype(jnp.float32)    # scalar -> SMEM
    return (w1_obs, w1_act, b1.astype(jnp.float32), w2c,
            b2.astype(jnp.float32), w3_rows, b3_sc)


def reference(x, a, params):
    w1, b1, w2, b2, w3, b3 = params
    B = x.shape[0]
    hp = jax.lax.Precision.HIGHEST
    xa = jnp.concatenate([x.reshape(B, -1), a], axis=1)
    h = jnp.maximum(jnp.dot(xa, w1, precision=hp) + b1, 0.0)
    h = jnp.maximum(jnp.dot(h, w2, precision=hp) + b2, 0.0)
    return jnp.dot(h, w3, precision=hp) + b3


if __name__ == "__main__":
    # Small, module-consistent shapes:
    #   observation space: (4, 8, 8) -> 256 flat features
    #   action space:      (8,)
    #   mlp_size = (64, 32)
    B, C, H, W = 8, 4, 8, 8
    A = 8
    mlp_size = (64, 32)
    obs_dim = C * H * W
    in_dim = obs_dim + A

    key = jax.random.PRNGKey(0)
    kx, ka, kp = jax.random.split(key, 3)
    x = jax.random.normal(kx, (B, C, H, W), dtype=jnp.float32)
    a = jax.random.normal(ka, (B, A), dtype=jnp.float32)
    params = init_params(kp, in_dim, mlp_size)
    kparams = prepare_params(params, obs_dim)

    # 1) Small batch -> gridless single-invocation path (f32 weights).
    out = jax.block_until_ready(soft_q_forward(x, a, kparams))
    ref = reference(x, a, params)
    assert out.shape == (B, 1)
    assert jnp.allclose(out, ref, atol=2e-3, rtol=2e-3), \
        float(jnp.max(jnp.abs(out - ref)))

    # 2) Large batch -> tiled path: 2 tiles x 2048 rows, lane-dense output.
    B2 = 4096
    kx2, ka2 = jax.random.split(jax.random.PRNGKey(1))
    x2 = jax.random.normal(kx2, (B2, C, H, W), dtype=jnp.float32)
    a2 = jax.random.normal(ka2, (B2, A), dtype=jnp.float32)
    out2 = jax.block_until_ready(soft_q_forward(x2, a2, kparams))
    ref2 = reference(x2, a2, params)
    assert out2.shape == (B2, 1)
    assert jnp.allclose(out2, ref2, atol=5e-3, rtol=5e-3), \
        float(jnp.max(jnp.abs(out2 - ref2)))

    # 3) Non-divisible large batch -> tiled path with a padded tail tile.
    B3 = 5000
    kx3, ka3 = jax.random.split(jax.random.PRNGKey(2))
    x3 = jax.random.normal(kx3, (B3, C, H, W), dtype=jnp.float32)
    a3 = jax.random.normal(ka3, (B3, A), dtype=jnp.float32)
    out3 = jax.block_until_ready(soft_q_forward(x3, a3, kparams))
    ref3 = reference(x3, a3, params)
    assert out3.shape == (B3, 1)
    assert jnp.allclose(out3, ref3, atol=5e-3, rtol=5e-3), \
        float(jnp.max(jnp.abs(out3 - ref3)))

    # 4) bf16 weights (MXU-native on v6e/v7x), f32 accumulation; loose check.
    kparams_bf16 = prepare_params(params, obs_dim, weights_dtype=jnp.bfloat16)
    out4 = jax.block_until_ready(soft_q_forward(x2, a2, kparams_bf16))
    assert out4.shape == (B2, 1)
    rel_err = float(jnp.max(jnp.abs(out4 - ref2)) /
                    (jnp.max(jnp.abs(ref2)) + 1e-6))
    assert rel_err < 3e-2, rel_err

    # TODO(synk): should_extract_features=True path (SGConv/GraphNorm/scatter
    # over torch_geometric graphs + nn.Embedding) is not implemented; only the
    # standard flatten+concat MLP Q-head path is covered.
    print("KERNEL_OK")
</pallas_src>

<mosaic_0001>
module attributes {stable_mosaic.version = 11 : i64} {
  func.func @_qnet_kernel(%arg0: memref<8x256xf32, #tpu.memory_space<vmem>>, %arg1: memref<8x8xf32, #tpu.memory_space<vmem>>, %arg2: memref<256x64xf32, #tpu.memory_space<vmem>>, %arg3: memref<8x64xf32, #tpu.memory_space<vmem>>, %arg4: memref<1x64xf32, #tpu.memory_space<vmem>>, %arg5: memref<64x32xf32, #tpu.memory_space<vmem>>, %arg6: memref<1x32xf32, #tpu.memory_space<vmem>>, %arg7: memref<8x32xf32, #tpu.memory_space<vmem>>, %arg8: memref<1x1xf32, #tpu.memory_space<smem>>, %arg9: memref<1x8xf32, #tpu.memory_space<vmem>>) attributes {dimension_semantics = [], scalar_prefetch = 0 : i64, scratch_operands = 0 : i64, tpu.core_type = #tpu.core_type<tc>} {
    %c0 = arith.constant 0 : index
    %c0_0 = arith.constant 0 : index
    %0 = vector.load %arg0[%c0, %c0_0] : memref<8x256xf32, #tpu.memory_space<vmem>>, vector<8x256xf32>
    %c0_1 = arith.constant 0 : index
    %c0_2 = arith.constant 0 : index
    %1 = vector.load %arg2[%c0_1, %c0_2] : memref<256x64xf32, #tpu.memory_space<vmem>>, vector<256x64xf32>
    %cst = arith.constant dense<0.000000e+00> : vector<8x64xf32>
    %2 = tpu.matmul %0, %1, %cst {dimension_numbers = #tpu.dot_dimension_numbers<[1], [0], [0], [1], [0, 0, 1, 1], [], []>} : vector<8x256xf32>, vector<256x64xf32>, vector<8x64xf32> -> vector<8x64xf32>
    %c0_3 = arith.constant 0 : index
    %c0_4 = arith.constant 0 : index
    %3 = vector.load %arg1[%c0_3, %c0_4] : memref<8x8xf32, #tpu.memory_space<vmem>>, vector<8x8xf32>
    %c0_5 = arith.constant 0 : index
    %c0_6 = arith.constant 0 : index
    %4 = vector.load %arg3[%c0_5, %c0_6] : memref<8x64xf32, #tpu.memory_space<vmem>>, vector<8x64xf32>
    %cst_7 = arith.constant dense<0.000000e+00> : vector<8x64xf32>
    %5 = tpu.matmul %3, %4, %cst_7 {dimension_numbers = #tpu.dot_dimension_numbers<[1], [0], [0], [1], [0, 0, 1, 1], [], []>} : vector<8x8xf32>, vector<8x64xf32>, vector<8x64xf32> -> vector<8x64xf32>
    %6 = arith.addf %2, %5 : vector<8x64xf32>
    %c0_8 = arith.constant 0 : index
    %c0_9 = arith.constant 0 : index
    %7 = vector.load %arg4[%c0_8, %c0_9] : memref<1x64xf32, #tpu.memory_space<vmem>>, vector<1x64xf32>
    %8 = vector.broadcast %7 : vector<1x64xf32> to vector<8x64xf32>
    %9 = arith.addf %6, %8 : vector<8x64xf32>
    %cst_10 = arith.constant 0.000000e+00 : f32
    %10 = vector.broadcast %cst_10 : f32 to vector<8x64xf32>
    %11 = arith.maximumf %9, %10 : vector<8x64xf32>
    %c0_11 = arith.constant 0 : index
    %c0_12 = arith.constant 0 : index
    %12 = vector.load %arg5[%c0_11, %c0_12] : memref<64x32xf32, #tpu.memory_space<vmem>>, vector<64x32xf32>
    %cst_13 = arith.constant dense<0.000000e+00> : vector<8x32xf32>
    %13 = tpu.matmul %11, %12, %cst_13 {dimension_numbers = #tpu.dot_dimension_numbers<[1], [0], [0], [1], [0, 0, 1, 1], [], []>} : vector<8x64xf32>, vector<64x32xf32>, vector<8x32xf32> -> vector<8x32xf32>
    %c0_14 = arith.constant 0 : index
    %c0_15 = arith.constant 0 : index
    %14 = vector.load %arg6[%c0_14, %c0_15] : memref<1x32xf32, #tpu.memory_space<vmem>>, vector<1x32xf32>
    %15 = vector.broadcast %14 : vector<1x32xf32> to vector<8x32xf32>
    %16 = arith.addf %13, %15 : vector<8x32xf32>
    %cst_16 = arith.constant 0.000000e+00 : f32
    %17 = vector.broadcast %cst_16 : f32 to vector<8x32xf32>
    %18 = arith.maximumf %16, %17 : vector<8x32xf32>
    %c0_17 = arith.constant 0 : index
    %c0_18 = arith.constant 0 : index
    %19 = vector.load %arg7[%c0_17, %c0_18] : memref<8x32xf32, #tpu.memory_space<vmem>>, vector<8x32xf32>
    "tpu.trace_start"() <{level = 10 : i32, message = "oh,bh->ob"}> : () -> ()
    %cst_19 = arith.constant dense<0.000000e+00> : vector<8x8xf32>
    %20 = tpu.matmul %19, %18, %cst_19 {dimension_numbers = #tpu.dot_dimension_numbers<[1], [1], [0], [0], [0, 0, 1, 0], [], []>} : vector<8x32xf32>, vector<8x32xf32>, vector<8x8xf32> -> vector<8x8xf32>
    "tpu.trace_stop"() : () -> ()
    %21 = vector.extract_strided_slice %20 {offsets = [0, 0], sizes = [1, 8], strides = [1, 1]} : vector<8x8xf32> to vector<1x8xf32>
    %c0_20 = arith.constant 0 : index
    %c0_21 = arith.constant 0 : index
    %22 = memref.load %arg8[%c0_20, %c0_21] : memref<1x1xf32, #tpu.memory_space<smem>>
    %23 = vector.broadcast %22 : f32 to vector<1x8xf32>
    %24 = arith.addf %21, %23 : vector<1x8xf32>
    %c0_22 = arith.constant 0 : index
    %c0_23 = arith.constant 0 : index
    %25 = vector.load %arg9[%c0_22, %c0_23] : memref<1x8xf32, #tpu.memory_space<vmem>>, vector<1x8xf32>
    tpu.vector_store %arg9[%c0_22, %c0_23], %24 {strides = array<i32>} : memref<1x8xf32, #tpu.memory_space<vmem>>, vector<1x8xf32>,
    return
  }
}

</mosaic_0001>

<bundles_post_ra>
// kernel: tpu_custom_call.1
= control target key start
LH: loop header
LB: loop body
LE: loop exit
PB: predicated region body
PF: predicated region fallthrough
CT: control target
= control target key end

     0   :  { %v565_v7 = vmov 0.0   ;;  %vm566_vm0 = vmmov 0   ;;  %vm70_vm1 = vcmask 64512   ;;  %s783_s0 = inlined_call_operand.vmem [shape: f32[8,256], index: 0, kind: input, shape index: {}]   ;;  %s784_s1 = inlined_call_operand.vmem [shape: f32[8,8], index: 1, kind: input, shape index: {}]   ;;  %s785_s2 = inlined_call_operand.vmem [shape: f32[256,64], index: 2, kind: input, shape index: {}]   ;;  %s786_s3 = inlined_call_operand.vmem [shape: f32[8,64], index: 3, kind: input, shape index: {}]   ;;  %s787_s4 = inlined_call_operand.vmem [shape: f32[1,64], index: 4, kind: input, shape index: {}]   ;;  %s788_s5 = inlined_call_operand.vmem [shape: f32[64,32], index: 5, kind: input, shape index: {}]   ;;  %s789_s6 = inlined_call_operand.vmem [shape: f32[1,32], index: 6, kind: input, shape index: {}]   ;;  %s790_s7 = inlined_call_operand.vmem [shape: f32[8,32], index: 7, kind: input, shape index: {}]   ;;  %s791_s8 = inlined_call_operand.<no memory space> [shape: f32[1,1], index: 8, kind: input, shape index: {}]   ;;  %s792_s9 = inlined_call_operand.hbm [shape: f32[1,8], index: 9, kind: output, shape index: {}]  }
   0x1   :  { %v52_v0 = vld [vmem:[%s785_s2 + $0x80] sm:$0xff]  ;;  %v53_v1 = vld [vmem:[%s785_s2 + $0x88] sm:$0xff]  ;;  %v54_v5 = vld [vmem:[%s785_s2 + $0x90] sm:$0xff]  ;;  %464 = vmatprep.subr.mxu0 %v565_v7  ;;  %466 = vmatprep.mubr.msk.f32.mxu0 %vm566_vm0, %v565_v7 }
   0x2   :  { %v36_v2 = vld [vmem:[%s785_s2] sm:$0xff]  ;;  %v493_v3 = vpack.c.bf16 %v53_v1, %v52_v0  ;;  %v37_v4 = vld [vmem:[%s785_s2 + $0x8] sm:$0xff]  ;;  %v55_v6 = vld [vmem:[%s785_s2 + $0x98] sm:$0xff] }
   0x3   :  { %v495_v8 = vpack.c.bf16 %v37_v4, %v36_v2  ;;  %v497_v9 = vpack.c.bf16 %v55_v6, %v54_v5  ;;  %v38_v10 = vld [vmem:[%s785_s2 + $0x10] sm:$0xff]  ;;  %v39_v11 = vld [vmem:[%s785_s2 + $0x18] sm:$0xff]  ;;  %v56_v12 = vld [vmem:[%s785_s2 + $0xa0] sm:$0xff] }
   0x4   :  { %494 = vmatprep.subr.bf16.mxu1 %v493_v3  ;;  %v57_v13 = vld [vmem:[%s785_s2 + $0xa8] sm:$0xff]  ;;  %v499_v14 = vpack.c.bf16 %v39_v11, %v38_v10  ;;  %v40_v16 = vld [vmem:[%s785_s2 + $0x20] sm:$0xff]  ;;  %v58_v18 = vld [vmem:[%s785_s2 + $0xb0] sm:$0xff] }
   0x5   :  { %496 = vmatpush3.bf16.msra.mxu1 %v495_v8  ;;  %v501_v15 = vpack.c.bf16 %v57_v13, %v56_v12  ;;  %v41_v17 = vld [vmem:[%s785_s2 + $0x28] sm:$0xff]  ;;  %v59_v19 = vld [vmem:[%s785_s2 + $0xb8] sm:$0xff]  ;;  %v42_v22 = vld [vmem:[%s785_s2 + $0x30] sm:$0xff] }
   0x6   :  { %498 = vmatprep.subr.bf16.mxu1 %v497_v9  ;;  %v503_v20 = vpack.c.bf16 %v41_v17, %v40_v16  ;;  %v505_v21 = vpack.c.bf16 %v59_v19, %v58_v18  ;;  %v43_v23 = vld [vmem:[%s785_s2 + $0x38] sm:$0xff]  ;;  %v60_v24 = vld [vmem:[%s785_s2 + $0xc0] sm:$0xff]  ;;  %v61_v25 = vld [vmem:[%s785_s2 + $0xc8] sm:$0xff] }
   0x7   :  { %v35_v26 = vld [vmem:[%s783_s0 + $0x8] sm:$0xff]  ;;  %v44_v27 = vld [vmem:[%s785_s2 + $0x40] sm:$0xff]  ;;  %v507_v30 = vpack.c.bf16 %v43_v23, %v42_v22  ;;  %v225_v33 = vld [vmem:[%s788_s5 + $0x10] sm:$0xff]  ;;  %v509_v34 = vpack.c.bf16 %v61_v25, %v60_v24 }
   0x8   :  { %208 = vmatprep.mubr.f32.mxu1 %v35_v26  ;;  %v69_v28 = vld [vmem:[%s786_s3] sm:$0xff]  ;;  %v224_v32 = vld [vmem:[%s788_s5 + $0x8] sm:$0xff]  ;;  %v226_v37 = vld [vmem:[%s788_s5 + $0x18] sm:$0xff] }
   0x9   :  { %500 = vmatpush3.bf16.msra.mxu1 %v499_v14  ;;  %v68_v29 = vld [vmem:[%s784_s1] sm:$0xff]  ;;  %465 = vmatpush3.msra.mxu0 %v69_v28  ;;  %v45_v35 = vld [vmem:[%s785_s2 + $0x48] sm:$0xff] }
   0xa   :  { %502 = vmatprep.subr.bf16.mxu1 %v501_v15  ;;  %v223_v31 = vld [vmem:[%s788_s5] sm:$0xff]  ;;  %467 = vmatmul.mubr.msk.f32.vlgmr.msra.gmra.mrb[0].mxu0 %vm70_vm1, %v68_v29 }
   0xb   :  { %v526_v36 = vpack.c.bf16 %v224_v32, %v223_v31 }
   0xd   :  { %504 = vmatpush3.bf16.msra.mxu1 %v503_v20 }
   0xe   :  { %506 = vmatprep.subr.bf16.mxu1 %v505_v21 }
   0xf   :  { %15 = vsyncpa [#allocation4], 0  ;;  %v62_v38 = vld [vmem:[%s785_s2 + $0xd0] sm:$0xff]  ;;  %v63_v39 = vld [vmem:[%s785_s2 + $0xd8] sm:$0xff]  ;;  %v567_v40 = vmov 0.0|0.0   ;;  %485 = vmatprep.mubr.msk.f32.mxu0 %vm566_vm0, %v565_v7  ;;  %v529_v41 = vpack.c.bf16 %v226_v37, %v225_v33  ;;  %v511_v42 = vpack.c.bf16 %v45_v35, %v44_v27  ;;  %vm238_vm2 = vcmask 523264  }
  0x10   :  { %525 = vmatprep.subr.bf16.mxu0 %v567_v40  ;;  %v513_v43 = vpack.c.bf16 %v63_v39, %v62_v38  ;;  %v46_v44 = vld [vmem:[%s785_s2 + $0x50] sm:$0xff]  ;;  %v47_v45 = vld [vmem:[%s785_s2 + $0x58] sm:$0xff]  ;;  %v64_v46 = vld [vmem:[%s785_s2 + $0xe0] sm:$0xff]  ;;  %vm314_vm3 = vcmask 261120   ;;  %v392_v18 = vstv %s791_s8  ;;  %s568_s13 = smov [#allocation3]   ;;  %vm394_vm4 = vcmask 57344  }
  0x11   :  { %527 = vmatpush3.bf16.msra.mxu0 %v526_v36  ;;  %508 = vmatpush3.bf16.msra.mxu1 %v507_v30  ;;  %v65_v47 = vld [vmem:[%s785_s2 + $0xe8] sm:$0xff]  ;;  %v515_v48 = vpack.c.bf16 %v47_v45, %v46_v44  ;;  %v48_v50 = vld [vmem:[%s785_s2 + $0x60] sm:$0xff]  ;;  %v66_v52 = vld [vmem:[%s785_s2 + $0xf0] sm:$0xff]  ;;  %s402_s14 = sshll.u32 %s568_s13, 4  ;;  %s403_s14 = int_to_ptr.vmem [resolvable:$true] %s402_s14 }
  0x12   :  { %528 = vmatprep.subr.bf16.mxu0 %v567_v40  ;;  %510 = vmatprep.subr.bf16.mxu1 %v509_v34  ;;  %v517_v49 = vpack.c.bf16 %v65_v47, %v64_v46  ;;  %v49_v51 = vld [vmem:[%s785_s2 + $0x68] sm:$0xff]  ;;  %v67_v53 = vld [vmem:[%s785_s2 + $0xf8] sm:$0xff]  ;;  %v50_v56 = vld [vmem:[%s785_s2 + $0x70] sm:$0xff]  ;;  %s545_s15 = scalar_lea.vmem %s403_s14, 32  ;;  %p546_p1 = scmp.lt.s32.totalorder %s403_s14, %s403_s14 }
  0x13   :  { %v519_v54 = vpack.c.bf16 %v49_v51, %v48_v50  ;;  %v521_v55 = vpack.c.bf16 %v67_v53, %v66_v52  ;;  %v51_v57 = vld [vmem:[%s785_s2 + $0x78] sm:$0xff]  ;;  %v34_v59 = vld [vmem:[%s783_s0] sm:$0xff]  ;;  %v228_v61 = vld [vmem:[%s788_s5 + $0x28] sm:$0xff] }
  0x14   :  { %v523_v58 = vpack.c.bf16 %v51_v57, %v50_v56  ;;  %v227_v60 = vld [vmem:[%s788_s5 + $0x20] sm:$0xff]  ;;  %v229_v63 = vld [vmem:[%s788_s5 + $0x30] sm:$0xff]  ;;  %v230_v0 = vld [vmem:[%s788_s5 + $0x38] sm:$0xff] }
  0x15   :  { %530 = vmatpush3.bf16.msra.mxu0 %v529_v41  ;;  %512 = vmatpush3.bf16.msra.mxu1 %v511_v42  ;;  %v532_v62 = vpack.c.bf16 %v228_v61, %v227_v60  ;;  %v535_v1 = vpack.c.bf16 %v230_v0, %v229_v63  ;;  %v411_v8 = vld [vmem:[%s787_s4] ss:$0 sm:$0xff] }
  0x16   :  { %531 = vmatprep.subr.bf16.mxu0 %v567_v40  ;;  %514 = vmatprep.subr.bf16.mxu1 %v513_v43  ;;  %v412_v12 = vld [vmem:[%s789_s6] ss:$0 sm:$0xff]  ;;  %s541_s6 = scalar_lea.vmem %s403_s14, 16 }
  0x17   :  { %v313_v17 = vld [vmem:[%s790_s7] sm:$0xff]  ;;  %p542_p0 = scmp.ne.s32.totalorder %s403_s14, %s541_s6  ;;  %p547_p2 = scmp.lt.s32.totalorder %s545_s15, %s541_s6 }
  0x19   :  { %516 = vmatpush3.bf16.msra.mxu1 %v515_v48  ;;  %533 = vmatpush3.bf16.msra.mxu0 %v532_v62  ;;  %p548_p3 = por %p547_p2, %p546_p1 }
  0x1a   :  { %518 = vmatprep.subr.bf16.mxu1 %v517_v49  ;;  %534 = vmatprep.subr.bf16.mxu0 %v567_v40 }
  0x1b   :  { %p549_p4 = pnand %p548_p3, %p542_p0 }
  0x1d   :  { %520 = vmatpush3.bf16.msra.mxu1 %v519_v54  ;;  %536 = vmatpush3.bf16.msra.mxu0 %v535_v1 }
  0x1e   :  { %522 = vmatprep.subr.bf16.mxu1 %v521_v55  ;;  %488 = vmatprep.subr.mxu0 %v565_v7 }
  0x21   :  { %524 = vmatpush3.bf16.msra.mxu1 %v523_v58 }
  0x24   :  { %209 = vmatmul.mubr.f32.vlgmr.msra.gmra.mrb[0].mxu1 %v34_v59 }
  0xdd   :  { %v140_v2 = vpop.f32.mrb[0].mxu0 }
  0xde   :  { %v468_v3 = vpop.f32.mrb[1].mxu0 }
  0xf7   :  { %v450_v4 = vpop.f32.mrb[0].mxu1 }
  0xf8   :  { %v451_v5 = vpop.f32.mrb[1].mxu1 }
  0xf9   :  { %v452_v6 = vadd.f32 %v451_v5, %v450_v4 }
  0xfb   :  { %v211_v9 = vadd.f32 %v452_v6, %v140_v2 }
  0xfd   :  { %v221_v10 = vadd.f32 %v411_v8, %v211_v9 }
  0xff   :  { %v222_v11 = vmax.f32 %v221_v10, 0.0 }
 0x101   :  { %486 = vmatmul.mubr.msk.f32.vlgmr.msra.gmra.mrb[2].mxu0 %vm238_vm2, %v222_v11 }
 0x102   :  { %490 = vmatprep.mubr.msk.f32.mxu0 %vm566_vm0, %v565_v7 }
 0x1d4   :  { %v308_v13 = vpop.f32.mrb[2].mxu0 }
 0x1d5   :  { %v309_v14 = vadd.f32 %v412_v12, %v308_v13  ;;  %v487_v15 = vpop.f32.mrb[3].mxu0 }
 0x1d7   :  { %v312_v16 = vmax.f32 %v309_v14, 0.0 }
 0x1d9   :  { %489 = vmatpush3.xpose.msk.msra.mxu0 %vm314_vm3, %v312_v16 }
 0x1dc   :  { %491 = vmatmul.mubr.msk.f32.vlgmr.msra.gmra.mrb[4].mxu0 %vm314_vm3, %v313_v17 }
 0x2af   :  { %v387_v7 = vpop.f32.mrb[4].mxu0 }
 0x2b0   :  { %v393_v19 = vadd.f32 %v392_v18, %v387_v7  ;;  %v492_v20 = vpop.f32.mrb[5].mxu0 }
 0x2b2   :  { %395 = vst.msk [vmem:[#allocation3] sm:$0x1] %vm394_vm4, %v393_v19 }
 0x2b3   :  { %552 = shalt.err (!%p549_p4)
}
 0x2b4   :  { %s553_s8 = scalar_lea.hbm %s792_s9, 16 }
 0x2b5   :  { %p554_p5 = scmp.ne.s32.totalorder %s792_s9, %s553_s8  ;;  %p557_p6 = scmp.lt.u32.totalorder %s553_s8, %s792_s9 }
 0x2b7   :  { %p559_p7 = pnand %p557_p6, %p554_p5 }
 0x2b9   :  { %562 = shalt.err (!%p559_p7)
}
 0x2ba   :  { %405 = dma.vmem_to_hbm [thread:$0]  %s403_s14, 16, %s792_s9, [#allocation4]  }
 0x2bb   :  { %563 = dma.done.wait [#allocation4], 16  }
 0x2bc   :  { %564 = vsyncadd [#allocation4], 4294967280 }
 0x2bd   :  { %409 = vsyncpa [#allocation4], 1 }

</bundles_post_ra>
